<compile_context>
chip_gen: v7x
topology: tpu7x:2x2x1
jax: 0.10.0
libtpu: 0.0.40
codegen_flags: <defaults>
</compile_context>

<pallas_src>
import math

import jax
import jax.numpy as jnp
from jax.experimental import pallas as pl
from jax.experimental.pallas import tpu as pltpu


def _make_kernel(n_deep):
    """Build the kernel body for a model with `n_deep` layers beyond layer 0."""

    def kernel(*refs):
        if n_deep > 0:
            (x_ref, w0_ref, b0_ref, wdeep_ref, bdeep_ref,
             wfc_ref, bfc_ref, o_ref) = refs
        else:
            x_ref, w0_ref, b0_ref, wfc_ref, bfc_ref, o_ref = refs
            wdeep_ref = bdeep_ref = None

        # Layer 0 (h0 == 0 -> only the input path + combined biases),
        # transposed:  hT = tanh(W_ih0 @ xT + b0)           -> (H, TB)
        h = jnp.tanh(
            jnp.dot(w0_ref[...], x_ref[...],
                    preferred_element_type=jnp.float32)
            + b0_ref[...]
        )

        # Deeper layers (static trip count -> unrolled at trace time).
        for l in range(n_deep):
            h = jnp.tanh(
                jnp.dot(wdeep_ref[l], h,
                        preferred_element_type=jnp.float32)
                + bdeep_ref[l]
            )

        # Final linear: a 1-output matmul wastes a full MXU pass, so do it as
        # a VPU multiply + sublane reduction.  Result is (1, TB): batch on
        # lanes -> fully lane-dense store.
        y = jnp.sum(h * wfc_ref[...], axis=0, keepdims=True) + bfc_ref[0]
        o_ref[...] = jax.nn.sigmoid(y)

    return kernel


def init_params(key, input_size, hidden_size, num_layers):
    """Deterministic init mirroring PyTorch shapes (uniform +/- 1/sqrt(H))."""
    bound = 1.0 / math.sqrt(hidden_size)
    keys = jax.random.split(key, 4 * num_layers + 2)
    ki = iter(range(len(keys)))

    def u(shape):
        return jax.random.uniform(keys[next(ki)], shape, jnp.float32,
                                  -bound, bound)

    # Layer 0: W_ih (H, input_size), W_hh (H, H) [unused: h0 == 0], b_ih, b_hh.
    w_ih0 = u((hidden_size, input_size))
    _ = u((hidden_size, hidden_size))
    b_ih0 = u((hidden_size,))
    b_hh0 = u((hidden_size,))

    wdeep, bdeep = [], []
    for _ in range(num_layers - 1):
        w_ih = u((hidden_size, hidden_size))
        _ = u((hidden_size, hidden_size))       # unused (h0 == 0)
        b_ih = u((hidden_size,))
        b_hh = u((hidden_size,))
        wdeep.append(w_ih)                      # used as-is: hT_l = W @ hT_{l-1}
        bdeep.append((b_ih + b_hh)[:, None])    # (H, 1), broadcasts over lanes

    w_fc = u((1, hidden_size))
    b_fc = u((1,))

    return dict(
        w0=w_ih0,                                   # (H, input_size)
        b0=(b_ih0 + b_hh0)[:, None],                # (H, 1)
        wdeep=jnp.stack(wdeep) if wdeep else None,  # (L-1, H, H) or None
        bdeep=jnp.stack(bdeep) if bdeep else None,  # (L-1, H, 1) or None
        wfc=w_fc.T,                                 # (H, 1)
        bfc=b_fc,                                   # (1,)  -> SMEM scalar
    )


def baseball_rnn_forward(x, params, *, batch_tile=512):
    """Pallas forward.  x: (B, input_size) f32 -> (B, 1) f32 (sigmoid)."""
    B, input_size = x.shape
    n_deep = 0 if params["wdeep"] is None else params["wdeep"].shape[0]

    x_t = x.T  # (input_size, B): batch -> lanes (layout plumbing in wrapper)
    if B <= batch_tile:
        TB, B_pad = B, B
    else:
        TB = batch_tile
        B_pad = pl.cdiv(B, TB) * TB
        if B_pad != B:
            x_t = jnp.pad(x_t, ((0, 0), (0, B_pad - B)))
    grid = (B_pad // TB,)

    args = [x_t, params["w0"], params["b0"]]
    in_specs = [
        # x stream: tiled along the batch/lane axis, double-buffered by Pallas.
        pl.BlockSpec((input_size, TB), lambda i: (0, i)),
        # Weights/biases: constant block index -> resident in VMEM across grid.
        pl.BlockSpec(params["w0"].shape, lambda i: (0, 0)),
        pl.BlockSpec(params["b0"].shape, lambda i: (0, 0)),
    ]
    if n_deep > 0:
        args += [params["wdeep"], params["bdeep"]]
        in_specs += [
            pl.BlockSpec(params["wdeep"].shape, lambda i: (0, 0, 0)),
            pl.BlockSpec(params["bdeep"].shape, lambda i: (0, 0, 0)),
        ]
    args += [params["wfc"], params["bfc"]]
    in_specs += [
        pl.BlockSpec(params["wfc"].shape, lambda i: (0, 0)),
        # fc bias: a single scalar -> SMEM, not a padded VMEM tile.
        pl.BlockSpec(memory_space=pltpu.MemorySpace.SMEM),
    ]

    out = pl.pallas_call(
        _make_kernel(n_deep),
        out_shape=jax.ShapeDtypeStruct((1, B_pad), jnp.float32),
        grid=grid,
        in_specs=in_specs,
        out_specs=pl.BlockSpec((1, TB), lambda i: (0, i)),
        compiler_params=pltpu.CompilerParams(
            dimension_semantics=("parallel",)),  # shards over v7x's 2 TCs
    )(*args)

    # Back to the module's (B, 1) shape (drop any batch padding).
    return out[0, :B][:, None]


def reference_forward(x, params):
    """Pure-JAX reference (standard batch-major layout) for a sanity check."""
    h = jnp.tanh(x @ params["w0"].T + params["b0"][:, 0][None, :])
    n_deep = 0 if params["wdeep"] is None else params["wdeep"].shape[0]
    for l in range(n_deep):
        h = jnp.tanh(h @ params["wdeep"][l].T
                     + params["bdeep"][l, :, 0][None, :])
    return jax.nn.sigmoid(h @ params["wfc"] + params["bfc"][None, :])


if __name__ == "__main__":
    B, INPUT_SIZE, HIDDEN, NUM_LAYERS = 4, 16, 32, 2

    key = jax.random.PRNGKey(0)
    kx, kp = jax.random.split(key)
    x = jax.random.normal(kx, (B, INPUT_SIZE), jnp.float32)
    params = init_params(kp, INPUT_SIZE, HIDDEN, NUM_LAYERS)

    out = jax.block_until_ready(baseball_rnn_forward(x, params))
    ref = reference_forward(x, params)
    assert out.shape == (B, 1)
    assert jnp.allclose(out, ref, atol=1e-5, rtol=1e-5), (out, ref)

    # Exercise the single-layer path (no deep-layer operands are passed).
    params1 = init_params(kp, INPUT_SIZE, HIDDEN, 1)
    out1 = jax.block_until_ready(baseball_rnn_forward(x, params1))
    ref1 = reference_forward(x, params1)
    assert jnp.allclose(out1, ref1, atol=1e-5, rtol=1e-5), (out1, ref1)

    # Exercise the multi-tile (gridded, padded) batch path.
    xb = jax.random.normal(kx, (300, INPUT_SIZE), jnp.float32)
    outb = jax.block_until_ready(
        baseball_rnn_forward(xb, params, batch_tile=128))
    refb = reference_forward(xb, params)
    assert outb.shape == (300, 1)
    assert jnp.allclose(outb, refb, atol=1e-5, rtol=1e-5)

    print("KERNEL_OK")
</pallas_src>

<mosaic_0001>
module attributes {stable_mosaic.version = 11 : i64} {
  func.func @kernel(%arg0: i32, %arg1: memref<16x4xf32, #tpu.memory_space<vmem>>, %arg2: memref<32x16xf32, #tpu.memory_space<vmem>>, %arg3: memref<32x1xf32, #tpu.memory_space<vmem>>, %arg4: memref<1x32x32xf32, #tpu.memory_space<vmem>>, %arg5: memref<1x32x1xf32, #tpu.memory_space<vmem>>, %arg6: memref<32x1xf32, #tpu.memory_space<vmem>>, %arg7: memref<1xf32, #tpu.memory_space<smem>>, %arg8: memref<1x4xf32, #tpu.memory_space<vmem>>) attributes {dimension_semantics = [#tpu.dimension_semantics<parallel>], iteration_bounds = array<i64: 1>, scalar_prefetch = 0 : i64, scratch_operands = 0 : i64, tpu.core_type = #tpu.core_type<tc>, window_params = [{transform_indices = @transform_0, window_bounds = array<i64: 16, 4>}, {pipeline_mode = #tpu.pipeline_mode<synchronous>, transform_indices = @transform_1, window_bounds = array<i64: 32, 16>}, {pipeline_mode = #tpu.pipeline_mode<synchronous>, transform_indices = @transform_2, window_bounds = array<i64: 32, 1>}, {pipeline_mode = #tpu.pipeline_mode<synchronous>, transform_indices = @transform_3, window_bounds = array<i64: 1, 32, 32>}, {pipeline_mode = #tpu.pipeline_mode<synchronous>, transform_indices = @transform_4, window_bounds = array<i64: 1, 32, 1>}, {pipeline_mode = #tpu.pipeline_mode<synchronous>, transform_indices = @transform_5, window_bounds = array<i64: 32, 1>}, {transform_indices = @transform_6, window_bounds = array<i64: 1>}, {transform_indices = @transform_7, window_bounds = array<i64: 1, 4>}]} {
    %c0 = arith.constant 0 : index
    %c0_0 = arith.constant 0 : index
    %0 = vector.load %arg2[%c0, %c0_0] : memref<32x16xf32, #tpu.memory_space<vmem>>, vector<32x16xf32>
    %c0_1 = arith.constant 0 : index
    %c0_2 = arith.constant 0 : index
    %1 = vector.load %arg1[%c0_1, %c0_2] : memref<16x4xf32, #tpu.memory_space<vmem>>, vector<16x4xf32>
    %cst = arith.constant dense<0.000000e+00> : vector<32x4xf32>
    %2 = tpu.matmul %0, %1, %cst {dimension_numbers = #tpu.dot_dimension_numbers<[1], [0], [0], [1], [0, 0, 1, 1], [], []>} : vector<32x16xf32>, vector<16x4xf32>, vector<32x4xf32> -> vector<32x4xf32>
    %c0_3 = arith.constant 0 : index
    %c0_4 = arith.constant 0 : index
    %3 = vector.load %arg3[%c0_3, %c0_4] : memref<32x1xf32, #tpu.memory_space<vmem>>, vector<32x1xf32>
    %4 = vector.broadcast %3 : vector<32x1xf32> to vector<32x4xf32>
    %5 = arith.addf %2, %4 : vector<32x4xf32>
    %6 = math.tanh %5 : vector<32x4xf32>
    %c0_5 = arith.constant 0 : index
    %c0_6 = arith.constant 0 : index
    %c0_7 = arith.constant 0 : index
    %7 = vector.load %arg4[%c0_5, %c0_6, %c0_7] : memref<1x32x32xf32, #tpu.memory_space<vmem>>, vector<1x32x32xf32>
    %8 = vector.shape_cast %7 : vector<1x32x32xf32> to vector<32x32xf32>
    %cst_8 = arith.constant dense<0.000000e+00> : vector<32x4xf32>
    %9 = tpu.matmul %8, %6, %cst_8 {dimension_numbers = #tpu.dot_dimension_numbers<[1], [0], [0], [1], [0, 0, 1, 1], [], []>} : vector<32x32xf32>, vector<32x4xf32>, vector<32x4xf32> -> vector<32x4xf32>
    %c0_9 = arith.constant 0 : index
    %c0_10 = arith.constant 0 : index
    %c0_11 = arith.constant 0 : index
    %10 = vector.load %arg5[%c0_9, %c0_10, %c0_11] : memref<1x32x1xf32, #tpu.memory_space<vmem>>, vector<1x32x1xf32>
    %11 = vector.shape_cast %10 : vector<1x32x1xf32> to vector<32x1xf32>
    %12 = vector.broadcast %11 : vector<32x1xf32> to vector<32x4xf32>
    %13 = arith.addf %9, %12 : vector<32x4xf32>
    %14 = math.tanh %13 : vector<32x4xf32>
    %c0_12 = arith.constant 0 : index
    %c0_13 = arith.constant 0 : index
    %15 = vector.load %arg6[%c0_12, %c0_13] : memref<32x1xf32, #tpu.memory_space<vmem>>, vector<32x1xf32>
    %16 = vector.broadcast %15 : vector<32x1xf32> to vector<32x4xf32>
    %17 = arith.mulf %14, %16 : vector<32x4xf32>
    %cst_14 = arith.constant dense<0.000000e+00> : vector<4xf32>
    %18 = vector.multi_reduction <add>, %17, %cst_14 [0] : vector<32x4xf32> to vector<4xf32>
    %19 = vector.shape_cast %18 : vector<4xf32> to vector<1x4xf32>
    %c0_15 = arith.constant 0 : index
    %20 = memref.load %arg7[%c0_15] : memref<1xf32, #tpu.memory_space<smem>>
    %21 = vector.broadcast %20 : f32 to vector<1x4xf32>
    %22 = arith.addf %19, %21 : vector<1x4xf32>
    %23 = arith.negf %22 : vector<1x4xf32>
    %24 = math.exp %23 : vector<1x4xf32>
    %cst_16 = arith.constant 1.000000e+00 : f32
    %25 = vector.broadcast %cst_16 : f32 to vector<1x4xf32>
    %26 = arith.addf %25, %24 : vector<1x4xf32>
    %27 = arith.divf %25, %26 : vector<1x4xf32>
    %c0_17 = arith.constant 0 : index
    %c0_18 = arith.constant 0 : index
    %28 = vector.load %arg8[%c0_17, %c0_18] : memref<1x4xf32, #tpu.memory_space<vmem>>, vector<1x4xf32>
    tpu.vector_store %arg8[%c0_17, %c0_18], %27 {strides = array<i32>} : memref<1x4xf32, #tpu.memory_space<vmem>>, vector<1x4xf32>,
    return
  }
  func.func @transform_0(%arg0: i32) -> (i32, i32) {
    %c0_i32 = arith.constant 0 : i32
    %c0_i32_0 = arith.constant 0 : i32
    return %c0_i32, %arg0 : i32, i32
  }
  func.func @transform_1(%arg0: i32) -> (i32, i32) {
    %c0_i32 = arith.constant 0 : i32
    %c0_i32_0 = arith.constant 0 : i32
    %c0_i32_1 = arith.constant 0 : i32
    return %c0_i32, %c0_i32_0 : i32, i32
  }
  func.func @transform_2(%arg0: i32) -> (i32, i32) {
    %c0_i32 = arith.constant 0 : i32
    %c0_i32_0 = arith.constant 0 : i32
    %c0_i32_1 = arith.constant 0 : i32
    return %c0_i32, %c0_i32_0 : i32, i32
  }
  func.func @transform_3(%arg0: i32) -> (i32, i32, i32) {
    %c0_i32 = arith.constant 0 : i32
    %c0_i32_0 = arith.constant 0 : i32
    %c0_i32_1 = arith.constant 0 : i32
    %c0_i32_2 = arith.constant 0 : i32
    return %c0_i32, %c0_i32_0, %c0_i32_1 : i32, i32, i32
  }
  func.func @transform_4(%arg0: i32) -> (i32, i32, i32) {
    %c0_i32 = arith.constant 0 : i32
    %c0_i32_0 = arith.constant 0 : i32
    %c0_i32_1 = arith.constant 0 : i32
    %c0_i32_2 = arith.constant 0 : i32
    return %c0_i32, %c0_i32_0, %c0_i32_1 : i32, i32, i32
  }
  func.func @transform_5(%arg0: i32) -> (i32, i32) {
    %c0_i32 = arith.constant 0 : i32
    %c0_i32_0 = arith.constant 0 : i32
    %c0_i32_1 = arith.constant 0 : i32
    return %c0_i32, %c0_i32_0 : i32, i32
  }
  func.func @transform_6(%arg0: i32) -> i32 {
    %c0_i32 = arith.constant 0 : i32
    %c0_i32_0 = arith.constant 0 : i32
    return %c0_i32 : i32
  }
  func.func @transform_7(%arg0: i32) -> (i32, i32) {
    %c0_i32 = arith.constant 0 : i32
    %c0_i32_0 = arith.constant 0 : i32
    return %c0_i32, %arg0 : i32, i32
  }
}

</mosaic_0001>

<bundles_post_ra>
// kernel: tpu_custom_call.1
= control target key start
LH: loop header
LB: loop body
LE: loop exit
PB: predicated region body
PF: predicated region fallthrough
CT: control target
= control target key end

     0   :  { %vm58_vm0 = vcmask 130048   ;;  %v464_v4 = vmov 0   ;;  %s595_s0 = inlined_call_operand.vmem [shape: f32[16,4], index: 0, kind: input, shape index: {}]   ;;  %s596_s1 = inlined_call_operand.vmem [shape: f32[32,16], index: 1, kind: input, shape index: {}]   ;;  %s597_s2 = inlined_call_operand.vmem [shape: f32[32,1], index: 2, kind: input, shape index: {}]   ;;  %s598_s3 = inlined_call_operand.vmem [shape: f32[1,32,32], index: 3, kind: input, shape index: {}]   ;;  %s599_s4 = inlined_call_operand.vmem [shape: f32[1,32,1], index: 4, kind: input, shape index: {}]   ;;  %s600_s5 = inlined_call_operand.vmem [shape: f32[32,1], index: 5, kind: input, shape index: {}]   ;;  %s601_s6 = inlined_call_operand.<no memory space> [shape: f32[1], index: 6, kind: input, shape index: {}]   ;;  %s602_s7 = inlined_call_operand.hbm [shape: f32[1,4], index: 7, kind: output, shape index: {}]  }
   0x1   :  { %v32_v0 = vld [vmem:[%s595_s0] sm:$0xff]  ;;  %v33_v1 = vld [vmem:[%s595_s0 + $0x8] sm:$0xff]  ;;  %418 = vset.pattern.permute.xlu0 %v464_v4  ;;  %419 = vset.pattern.permute.xlu1 %v464_v4  ;;  %v36_v6 = vld [vmem:[%s597_s2 + $0x10] sm:$0xff] }
   0x2   :  { %v28_v2 = vld [vmem:[%s596_s1] sm:$0xff]  ;;  %v404_v3 = vpack.c.bf16 %v33_v1, %v32_v0  ;;  %v29_v7 = vld [vmem:[%s596_s1 + $0x8] sm:$0xff]  ;;  %50 = vperm.xlu1 %419, %v36_v6   ;;  %v30_v9 = vld [vmem:[%s596_s1 + $0x10] sm:$0xff] }
   0x3   :  { %384 = vmatprep.mubr.msk.f32.mxu0 %vm58_vm0, %v28_v2  ;;  %v34_v5 = vld [vmem:[%s597_s2] sm:$0xff]  ;;  %v35_v8 = vld [vmem:[%s597_s2 + $0x8] sm:$0xff]  ;;  %v37_v10 = vld [vmem:[%s597_s2 + $0x18] sm:$0xff] }
   0x4   :  { %405 = vmatprep.subr.bf16.mxu0 %v404_v3  ;;  %40 = vperm.xlu0 %418, %v34_v5  }
   0x5   :  { %407 = vmatpush3.bf16.msra.mxu0 %v404_v3 }
   0x6   :  { %13 = vsyncpa [#allocation4], 0  ;;  %v31_v11 = vld [vmem:[%s596_s1 + $0x18] sm:$0xff]  ;;  %55 = vperm.xlu1 %419, %v37_v10   ;;  %v164_v12 = vld [vmem:[%s599_s4] sm:$0xff]  ;;  %vm188_vm1 = vcmask 261120   ;;  %vm318_vm2 = vcmask 31744  }
   0x7   :  { %v165_v13 = vld [vmem:[%s599_s4 + $0x8] sm:$0xff]  ;;  %v166_v14 = vld [vmem:[%s599_s4 + $0x10] sm:$0xff]  ;;  %v167_v15 = vld [vmem:[%s599_s4 + $0x18] sm:$0xff]  ;;  %s465_s17 = smov [#allocation3]   ;;  %vm341_vm3 = vcmask 24576  }
   0x8   :  { %385 = vmatmul.mubr.msk.f32.vlgmr.msra.gmra.mrb[0].mxu0 %vm58_vm0, %v29_v7  ;;  %45 = vperm.xlu0 %418, %v35_v8   ;;  %v290_v16 = vld [vmem:[%s600_s5] sm:$0xff]  ;;  %v291_v17 = vld [vmem:[%s600_s5 + $0x8] sm:$0xff]  ;;  %v292_v18 = vld [vmem:[%s600_s5 + $0x10] sm:$0xff]  ;;  %s349_s18 = sshll.u32 %s465_s17, 4  ;;  %s350_s18 = int_to_ptr.vmem [resolvable:$true] %s349_s18 }
   0x9   :  { %387 = vmatprep.mubr.msk.f32.mxu0 %vm58_vm0, %v30_v9  ;;  %v293_v19 = vld [vmem:[%s600_s5 + $0x18] sm:$0xff]  ;;  %v160_v20 = vld [vmem:[%s598_s3] sm:$0xff]  ;;  %v161_v39 = vld [vmem:[%s598_s3 + $0x8] sm:$0xff]  ;;  %s440_s19 = scalar_lea.vmem %s350_s18, 16  ;;  %s444_s20 = scalar_lea.vmem %s350_s18, 32 }
   0xa   :  { %175 = vperm.xlu1 %419, %v165_v13   ;;  %398 = vmatprep.mubr.msk.f32.mxu1 %vm188_vm1, %v160_v20  ;;  %v162_v40 = vld [vmem:[%s598_s3 + $0x10] sm:$0xff]  ;;  %v163_v41 = vld [vmem:[%s598_s3 + $0x18] sm:$0xff]  ;;  %p441_p0 = scmp.ne.s32.totalorder %s350_s18, %s440_s19  ;;  %p445_p1 = scmp.lt.s32.totalorder %s350_s18, %s350_s18 }
   0xb   :  { %p446_p2 = scmp.lt.s32.totalorder %s444_s20, %s440_s19 }
   0xc   :  { %388 = vmatmul.mubr.msk.f32.gmra.mrb[2].mxu0 %vm58_vm0, %v31_v11  ;;  %170 = vperm.xlu0 %418, %v164_v12  }
   0xd   :  { %p447_p3 = por %p446_p2, %p445_p1 }
   0xe   :  { %185 = vperm.xlu1 %419, %v167_v15  }
   0xf   :  { %p448_p4 = pnand %p447_p3, %p441_p0 }
  0x10   :  { %180 = vperm.xlu0 %418, %v166_v14   ;;  %v333_v14 = vstv %s601_s6 }
  0x12   :  { %301 = vperm.xlu1 %419, %v291_v17  }
  0x14   :  { %296 = vperm.xlu0 %418, %v290_v16  }
  0x16   :  { %311 = vperm.xlu1 %419, %v293_v19  }
  0x18   :  { %306 = vperm.xlu0 %418, %v292_v18  }
  0x81   :  { %v51_v22 = vpop.permute.xlu1 %50 }
  0x83   :  { %v41_v21 = vpop.permute.xlu0 %40 }
  0x85   :  { %v56_v28 = vpop.permute.xlu1 %55 }
  0x87   :  { %v46_v23 = vpop.permute.xlu0 %45 }
  0x89   :  { %v176_v42 = vpop.permute.xlu1 %175 }
  0x8b   :  { %v171_v43 = vpop.permute.xlu0 %170 }
  0x8d   :  { %v186_v48 = vpop.permute.xlu1 %185 }
  0x8f   :  { %v181_v50 = vpop.permute.xlu0 %180 }
  0x91   :  { %v302_v55 = vpop.permute.xlu1 %301 }
  0x93   :  { %v297_v54 = vpop.permute.xlu0 %296 }
  0x95   :  { %v312_v1 = vpop.permute.xlu1 %311 }
  0x97   :  { %v307_v0 = vpop.permute.xlu0 %306 }
  0xdb   :  { %v386_v24 = vpop.f32.mrb[0].mxu0 }
  0xdc   :  { %v143_v25 = vadd.f32 %v386_v24, %v46_v23  ;;  %v137_v26 = vpop.f32.mrb[1].mxu0 }
  0xdd   :  { %v138_v27 = vadd.f32 %v137_v26, %v41_v21 }
  0xde   :  { %420 = vtanh.f32 %v143_v25 }
  0xdf   :  { %422 = vtanh.f32 %v138_v27  ;;  %v389_v29 = vpop.f32.mrb[2].mxu0 }
  0xe0   :  { %v153_v30 = vadd.f32 %v389_v29, %v56_v28  ;;  %v147_v31 = vpop.f32.mrb[3].mxu0 }
  0xe1   :  { %v148_v32 = vadd.f32 %v147_v31, %v51_v22 }
  0xe2   :  { %424 = vtanh.f32 %v153_v30 }
  0xe3   :  { %426 = vtanh.f32 %v148_v32 }
  0xe8   :  { %v421_v33 = vpop.eup %420 }
  0xe9   :  { %v423_v34 = vpop.eup %422 }
  0xea   :  { %v408_v35 = vpack.c.bf16 %v421_v33, %v423_v34 }
  0xec   :  { %v425_v36 = vpop.eup %424  ;;  %409 = vmatprep.subr.bf16.mxu1 %v408_v35 }
  0xed   :  { %v427_v37 = vpop.eup %426  ;;  %411 = vmatpush3.bf16.msra.mxu1 %v408_v35 }
  0xee   :  { %v412_v38 = vpack.c.bf16 %v425_v36, %v427_v37 }
  0xf0   :  { %413 = vmatprep.subr.bf16.mxu1 %v412_v38 }
  0xf1   :  { %415 = vmatpush3.bf16.msra.mxu1 %v412_v38 }
  0xf4   :  { %399 = vmatmul.mubr.msk.f32.vlgmr.msra.gmra.mrb[0].mxu1 %vm188_vm1, %v161_v39 }
  0xf5   :  { %401 = vmatprep.mubr.msk.f32.mxu1 %vm188_vm1, %v162_v40 }
  0xf8   :  { %402 = vmatmul.mubr.msk.f32.gmra.mrb[2].mxu1 %vm188_vm1, %v163_v41 }
 0x1c7   :  { %v400_v44 = vpop.f32.mrb[0].mxu1 }
 0x1c8   :  { %v273_v45 = vadd.f32 %v400_v44, %v176_v42  ;;  %v267_v46 = vpop.f32.mrb[1].mxu1 }
 0x1c9   :  { %v268_v47 = vadd.f32 %v267_v46, %v171_v43 }
 0x1ca   :  { %428 = vtanh.f32 %v273_v45 }
 0x1cb   :  { %430 = vtanh.f32 %v268_v47  ;;  %v403_v49 = vpop.f32.mrb[2].mxu1 }
 0x1cc   :  { %v283_v51 = vadd.f32 %v403_v49, %v186_v48  ;;  %v277_v52 = vpop.f32.mrb[3].mxu1 }
 0x1cd   :  { %v278_v53 = vadd.f32 %v277_v52, %v181_v50 }
 0x1ce   :  { %432 = vtanh.f32 %v283_v51 }
 0x1cf   :  { %434 = vtanh.f32 %v278_v53 }
 0x1d4   :  { %v429_v56 = vpop.eup %428 }
 0x1d5   :  { %v431_v57 = vpop.eup %430  ;;  %v315_v58 = vmul.f32 %v429_v56, %v302_v55 }
 0x1d6   :  { %v314_v59 = vmul.f32 %v431_v57, %v297_v54 }
 0x1d7   :  { %v320_v60 = vsel %vm318_vm2, %v315_v58, 0.0 }
 0x1d8   :  { %v433_v61 = vpop.eup %432  ;;  %v319_v62 = vsel %vm318_vm2, %v314_v59, 0.0 }
 0x1d9   :  { %v435_v63 = vpop.eup %434  ;;  %v321_v2 = vadd.f32 %v320_v60, %v319_v62  ;;  %v317_v3 = vmul.f32 %v433_v61, %v312_v1 }
 0x1da   :  { %v316_v4 = vmul.f32 %v435_v63, %v307_v0 }
 0x1db   :  { %v324_v7 = vsel %vm318_vm2, %v317_v3, 0.0 }
 0x1dc   :  { %v322_v5 = vsel %vm318_vm2, %v316_v4, 0.0 }
 0x1dd   :  { %v323_v6 = vadd.f32 %v322_v5, %v321_v2 }
 0x1df   :  { %v325_v8 = vadd.f32 %v324_v7, %v323_v6 }
 0x1e1   :  { %v326_v9 = vrot.slane %v325_v8, 4 }
 0x1e3   :  { %v327_v10 = vadd.f32 %v326_v9, %v325_v8 }
 0x1e5   :  { %v328_v11 = vrot.slane %v327_v10, 2 }
 0x1e7   :  { %v329_v12 = vadd.f32 %v328_v11, %v327_v10 }
 0x1e9   :  { %v330_v13 = vrot.slane %v329_v12, 1 }
 0x1eb   :  { %v331_v15 = vadd.f32 %v330_v13, %v329_v12 }
 0x1ed   :  { %v334_v16 = vadd.f32 %v333_v14, %v331_v15 }
 0x1ef   :  { %v365_v17 = vmul.f32 -1.442695, %v334_v16 }
 0x1f1   :  { %436 = vpow2.f32 %v365_v17 }
 0x1fb   :  { %v437_v18 = vpop.eup %436 }
 0x1fc   :  { %v338_v19 = vadd.f32 1.0, %v437_v18 }
 0x1fe   :  { %438 = vrcp.f32 %v338_v19 }
 0x208   :  { %v439_v20 = vpop.eup %438 }
 0x209   :  { %342 = vst.msk [vmem:[#allocation3] sm:$0x1] %vm341_vm3, %v439_v20 }
 0x20a   :  { %451 = shalt.err (!%p448_p4)
}
 0x20b   :  { %s452_s22 = scalar_lea.hbm %s602_s7, 16 }
 0x20c   :  { %p453_p5 = scmp.ne.s32.totalorder %s602_s7, %s452_s22  ;;  %p456_p6 = scmp.lt.u32.totalorder %s452_s22, %s602_s7 }
 0x20e   :  { %p458_p7 = pnand %p456_p6, %p453_p5 }
 0x210   :  { %461 = shalt.err (!%p458_p7)
}
 0x211   :  { %352 = dma.vmem_to_hbm [thread:$0]  %s350_s18, 16, %s602_s7, [#allocation4]  }
 0x212   :  { %462 = dma.done.wait [#allocation4], 16  }
 0x213   :  { %463 = vsyncadd [#allocation4], 4294967280 }
 0x214   :  { %356 = vsyncpa [#allocation4], 1 }

</bundles_post_ra>
